<compile_context>
chip_gen: v6e
topology: v6e:2x2x1
jax: 0.10.0
libtpu: 0.0.40
codegen_flags: <defaults>
</compile_context>

<pallas_src>
import jax
import jax.numpy as jnp
from jax import lax
from jax.experimental import pallas as pl
from jax.experimental.pallas import tpu as pltpu

EPS = 1e-5


def _round_up(x, m):
    return ((x + m - 1) // m) * m


def _vmem_limit_bytes():
    """Per-chip VMEM budget: ~3/4 of physical, capped at 96 MiB.

    v5e/v6e (128 MiB physical) -> 96 MiB; v7x (64 MiB) -> 48 MiB.  Leaves
    headroom for Mosaic-internal scratch while allowing multi-MB bands.
    """
    try:
        cap = int(pltpu.get_tpu_info().vmem_capacity_bytes)
    except Exception:  # e.g. interpret mode / info unavailable
        cap = 64 * 1024 * 1024
    return max(32 * 1024 * 1024, min((cap * 3) // 4, 96 * 1024 * 1024))


def _try_single_buffer(fn, *args, **kwargs):
    """Prefer single-buffered constant weights (pl.Buffered(1)); fall back to
    default double buffering if this jax/Mosaic build rejects it."""
    try:
        return fn(*args, single_buffer_weights=True, **kwargs)
    except Exception:  # pragma: no cover - VMEM-only fallback, not correctness
        return fn(*args, single_buffer_weights=False, **kwargs)


# ----------------------------- Pallas kernels ------------------------------ #

def _pointwise_kernel(x_ref, w_ref, b_ref, o_ref):
    # relu(x @ W1_eff + b1_eff)  ==  relu(bn1(conv1(x)))   (bf16 in, f32 acc)
    y = jnp.dot(x_ref[...], w_ref[...], preferred_element_type=jnp.float32)
    o_ref[...] = jnp.maximum(y + b_ref[...], 0.0).astype(o_ref.dtype)


def _make_tail_kernel(stride, identity, fat_k):
    """Tail kernel: conv2(3x3,stride)+BN2+ReLU, conv3(1x1)+BN3, residual, ReLU.

    The 3x3 taps are built in-kernel from the s x s phase split of h1 (view A
    = this band, view B = max_a halo rows of the next band), so no im2col is
    ever materialized in HBM.
    """
    s = stride
    max_a = 2 // s           # extra row offsets needed beyond the band
    phase_p = min(s, 3)

    def kernel(*refs):
        if max_a > 0:
            pa_ref, pb_ref = refs[0], refs[1]
            rest = refs[2:]
        else:
            pa_ref, pb_ref = refs[0], None
            rest = refs[1:]
        if identity:
            r_ref, w2_ref, b2_ref, w3_ref, b3_ref, o_ref = rest
            wd_ref = bd_ref = None
        else:
            r_ref, w2_ref, b2_ref, w3_ref, b3_ref, wd_ref, bd_ref, o_ref = rest

        _, tho, wc, cm = pa_ref.shape
        _, _, wo, cout = o_ref.shape
        rows = tho * wo

        # Build each distinct (phase, row-shift) band exactly once and reuse
        # it for all kw taps that share it (2-3 taps per band).  The
        # concatenate is a whole-band sublane relayout; dedup cuts it ~2-3x.
        bands = {}
        for kh in range(3):
            pr, ah = kh % s, kh // s
            for kw in range(3):
                pc = kw % s
                key = (pr * phase_p + pc, ah)
                if key in bands:
                    continue
                pidx = key[0]
                a_band = pa_ref[pidx]                       # (t_ho, wc, cm)
                if ah == 0:
                    band = a_band
                elif ah >= tho:                             # whole band from halo view
                    band = pb_ref[pidx][:tho]
                else:
                    band = jnp.concatenate(
                        [a_band[ah:], pb_ref[pidx][:ah]], axis=0)
                bands[key] = band

        taps = []
        acc = None
        for kh in range(3):
            pr, ah = kh % s, kh // s
            for kw in range(3):
                pc, aw = kw % s, kw // s
                band = bands[(pr * phase_p + pc, ah)]
                tap = band[:, aw:aw + wo, :].reshape(rows, cm)
                if fat_k:
                    taps.append(tap)
                else:
                    d = jnp.dot(tap, w2_ref[kh, kw],
                                preferred_element_type=jnp.float32)
                    acc = d if acc is None else acc + d
        if fat_k:
            # Single fat-K matmul (rows, 9*Cm) x (9*Cm, Cm): keeps the 256-wide
            # MXU (v6e/v7x) full and avoids 8 result pops + 8 f32 adds.
            patch = jnp.concatenate(taps, axis=-1)
            acc = jnp.dot(patch, w2_ref[...],
                          preferred_element_type=jnp.float32)

        h2 = jnp.maximum(acc + b2_ref[...], 0.0)            # f32
        h3 = jnp.dot(h2.astype(jnp.bfloat16), w3_ref[...],
                     preferred_element_type=jnp.float32) + b3_ref[...]

        r2d = r_ref[...].reshape(rows, r_ref.shape[-1])
        if identity:
            res = r2d.astype(jnp.float32)                   # no Wd=I matmul
        else:
            res = jnp.dot(r2d, wd_ref[...],
                          preferred_element_type=jnp.float32) + bd_ref[...]
        out = jnp.maximum(h3 + res, 0.0)
        o_ref[...] = out.reshape(1, tho, wo, cout).astype(o_ref.dtype)

    return kernel


# ---------------------------- pallas_call wrappers -------------------------- #

def _pointwise(x2d, w, b, tile_rows, *, single_buffer_weights, vmem_limit):
    m, cin = x2d.shape
    cmid = w.shape[1]
    grid = (m // tile_rows,)

    def const_spec(shape):
        idx = lambda i: (0,) * len(shape)
        if single_buffer_weights:
            return pl.BlockSpec(shape, idx, pipeline_mode=pl.Buffered(1))
        return pl.BlockSpec(shape, idx)

    return pl.pallas_call(
        _pointwise_kernel,
        out_shape=jax.ShapeDtypeStruct((m, cmid), jnp.bfloat16),
        grid_spec=pltpu.PrefetchScalarGridSpec(
            num_scalar_prefetch=0,
            grid=grid,
            in_specs=[
                pl.BlockSpec((tile_rows, cin), lambda i: (i, 0)),
                const_spec((cin, cmid)),
                const_spec((1, cmid)),
            ],
            out_specs=pl.BlockSpec((tile_rows, cmid), lambda i: (i, 0)),
        ),
        compiler_params=pltpu.CompilerParams(
            dimension_semantics=("parallel",),
            vmem_limit_bytes=vmem_limit),
    )(x2d, w, b.reshape(1, cmid))


def _tail(phases, resid, w2, b2, w3, b3, wd, bd, *, stride, t_ho, n_hb,
          identity, fat_k, out_dtype, single_buffer_weights, vmem_limit):
    s = stride
    max_a = 2 // s
    npp, hbp, wc, cm = phases.shape
    n, hop, wo, cr = resid.shape
    pp = npp // n
    cmid = w3.shape[0]
    cout = w3.shape[1]
    hb_blocks = (t_ho // max_a) if max_a > 0 else 0

    kernel = _make_tail_kernel(s, identity, fat_k)

    def const_spec(shape):
        idx = lambda b, i: (0,) * len(shape)
        if single_buffer_weights:
            return pl.BlockSpec(shape, idx, pipeline_mode=pl.Buffered(1))
        return pl.BlockSpec(shape, idx)

    inputs = [phases]
    in_specs = [pl.BlockSpec((pp, t_ho, wc, cm), lambda b, i: (b, i, 0, 0))]
    if max_a > 0:
        # Halo view: only max_a rows past this band are re-fetched.
        inputs.append(phases)
        in_specs.append(pl.BlockSpec(
            (pp, max_a, wc, cm),
            lambda b, i: (b, (i + 1) * hb_blocks, 0, 0)))

    inputs += [resid, w2, b2.reshape(1, cmid), w3, b3.reshape(1, cout)]
    in_specs += [
        pl.BlockSpec((1, t_ho, wo, cr), lambda b, i: (b, i, 0, 0)),
        const_spec(w2.shape),
        const_spec((1, cmid)),
        const_spec((cmid, cout)),
        const_spec((1, cout)),
    ]
    if not identity:
        inputs += [wd, bd.reshape(1, cout)]
        in_specs += [const_spec((cr, cout)), const_spec((1, cout))]

    return pl.pallas_call(
        kernel,
        out_shape=jax.ShapeDtypeStruct((n, hop, wo, cout), out_dtype),
        grid_spec=pltpu.PrefetchScalarGridSpec(
            num_scalar_prefetch=0,
            grid=(n, n_hb),
            in_specs=in_specs,
            out_specs=pl.BlockSpec((1, t_ho, wo, cout),
                                   lambda b, i: (b, i, 0, 0)),
        ),
        compiler_params=pltpu.CompilerParams(
            dimension_semantics=("parallel", "parallel"),
            vmem_limit_bytes=vmem_limit),
    )(*inputs)


# --------------------------- parameter handling ---------------------------- #

def init_params(key, cin, cout, stride):
    cm = cout // 4
    ks = jax.random.split(key, 10)

    def bn_params(k, c):
        k1, k2, k3, k4 = jax.random.split(k, 4)
        gamma = jax.random.uniform(k1, (c,), jnp.float32, 0.5, 1.5)
        beta = 0.1 * jax.random.normal(k2, (c,), jnp.float32)
        mean = 0.1 * jax.random.normal(k3, (c,), jnp.float32)
        var = jax.random.uniform(k4, (c,), jnp.float32, 0.5, 1.5)
        return (gamma, beta, mean, var)

    p = {
        "conv1_w": 0.3 * jax.random.normal(ks[0], (cm, cin, 1, 1), jnp.float32),
        "bn1": bn_params(ks[1], cm),
        "conv2_w": 0.3 * jax.random.normal(ks[2], (cm, cm, 3, 3), jnp.float32),
        "bn2": bn_params(ks[3], cm),
        "conv3_w": 0.3 * jax.random.normal(ks[4], (cout, cm, 1, 1), jnp.float32),
        "bn3": bn_params(ks[5], cout),
    }
    if stride != 1 or cin != cout:
        p["convd_w"] = 0.3 * jax.random.normal(ks[6], (cout, cin, 1, 1), jnp.float32)
        p["convd_b"] = 0.1 * jax.random.normal(ks[7], (cout,), jnp.float32)
        p["bnd"] = bn_params(ks[8], cout)
    return p


def _fold(w_oihw, bn, bias=None):
    """Fold eval-mode BN into conv: ((kh*kw*Cin, Cout) weight, (Cout,) bias)."""
    gamma, beta, mean, var = bn
    scale = gamma / jnp.sqrt(var + EPS)                    # (Cout,)
    w = jnp.transpose(w_oihw, (2, 3, 1, 0)) * scale        # (kh, kw, Cin, Cout)
    kh, kw, ci, co = w.shape
    w = w.reshape(kh * kw * ci, co)
    b0 = bias if bias is not None else jnp.zeros((co,), jnp.float32)
    b_eff = (b0 - mean) * scale + beta
    return w.astype(jnp.float32), b_eff.astype(jnp.float32)


# ------------------------------ forward pass ------------------------------- #

def residual_block(x_nchw, params, stride, *, tile_rows=512,
                   band_target_rows=1024, out_dtype=jnp.float32):
    # TODO(synk): accept/return NHWC bf16 directly when blocks are chained to
    #             drop the NCHW<->NHWC wrapper transposes.
    n, cin, h, w = x_nchw.shape
    cm = params["conv1_w"].shape[0]
    cout = params["conv3_w"].shape[0]
    s = stride
    ho = (h + 2 - 3) // s + 1
    wo = (w + 2 - 3) // s + 1
    identity = "convd_w" not in params
    if identity:
        assert s == 1 and cin == cout, \
            "identity residual requires stride==1 and cin==cout"

    vmem_limit = _vmem_limit_bytes()

    # ---- fold BN into convs; bf16 weights, f32 biases ----
    w1, b1 = _fold(params["conv1_w"], params["bn1"])              # (Cin, Cm)
    w2, b2 = _fold(params["conv2_w"], params["bn2"])              # (9*Cm, Cm)
    w3, b3 = _fold(params["conv3_w"], params["bn3"])              # (Cm, Cout)
    wd = bd = None
    if not identity:
        wd, bd = _fold(params["convd_w"], params["bnd"], params["convd_b"])

    # conv2 formulation: fat-K single dot up to Cm=128 (fills the 256-wide
    # MXU on v6e/v7x); nine accumulating (Cm,Cm) slabs for wider Cm (fine on
    # v5e's 128-wide MXU, cheap on v7x thanks to the MRB).
    # TODO(synk): group taps into K>=256 chunks for Cm in {256, 512} on v6e.
    fat_k = cm <= 128
    if not fat_k:
        w2 = w2.reshape(3, 3, cm, cm)
    w1 = w1.astype(jnp.bfloat16)
    w2 = w2.astype(jnp.bfloat16)
    w3 = w3.astype(jnp.bfloat16)
    if wd is not None:
        wd = wd.astype(jnp.bfloat16)

    x = jnp.transpose(x_nchw, (0, 2, 3, 1)).astype(jnp.bfloat16)  # NHWC, bf16

    # ---- stage 1: conv1 (1x1) + BN1 + ReLU, fixed-size row tiles ----
    m1 = n * h * w
    t1 = max(16, min(_round_up(tile_rows, 16), _round_up(m1, 16)))
    m1p = _round_up(m1, t1)
    x2d = x.reshape(m1, cin)
    if m1p > m1:
        x2d = jnp.pad(x2d, ((0, m1p - m1), (0, 0)))
    h1 = _try_single_buffer(_pointwise, x2d, w1, b1, t1,
                            vmem_limit=vmem_limit)[:m1].reshape(n, h, w, cm)

    # ---- band tiling parameters for stage 2 ----
    max_a = 2 // s
    phase_p = min(s, 3)
    t_ho = max(2, min(ho, band_target_rows // max(1, wo)))
    t_ho = _round_up(t_ho, 2)
    if n == 1 and ho > 2:
        # keep >= 2 tail grid steps so both v7x TensorCores get work
        t_ho = min(t_ho, _round_up(int(pl.cdiv(ho, 2)), 2))
    n_hb = int(pl.cdiv(ho, t_ho))
    hop = n_hb * t_ho
    hbp = hop + max_a                 # only max_a halo rows past the last band
    hr = ho + max_a
    wc = _round_up(wo + max_a, 8)     # 8-aligned band width (tile-friendly taps)

    # ---- glue (plain JAX, ~1x h1 bytes): zero-pad + s x s phase split.
    # No 9x-wide im2col is ever written to HBM; the 3x3 taps are contiguous
    # slices of these phases inside the tail kernel.
    # TODO(synk): eliminate this pass entirely (read h1 + mask border
    #             in-kernel for stride==1; Pallas relayout for stride==2).
    hneed = s * (hr - 1) + phase_p
    wneed = s * (wc - 1) + phase_p
    h1p = jnp.pad(h1, ((0, 0),
                       (1, max(1, hneed - (h + 1))),
                       (1, max(1, wneed - (w + 1))),
                       (0, 0)))
    phase_list = []
    for pr in range(phase_p):
        for pc in range(phase_p):
            sl = h1p[:, pr::s, pc::s, :][:, :hr, :wc, :]
            sl = jnp.pad(sl, ((0, 0), (0, hbp - hr), (0, 0), (0, 0)))
            phase_list.append(sl)
    phases = jnp.stack(phase_list, axis=1).reshape(n * phase_p * phase_p,
                                                   hbp, wc, cm)

    if identity:
        resid = x                                                  # (n, ho, wo, cout)
    else:
        resid = x[:, ::s, ::s, :][:, :ho, :wo, :]                  # (n, ho, wo, cin)
    if hop > ho:
        resid = jnp.pad(resid, ((0, 0), (0, hop - ho), (0, 0), (0, 0)))

    # ---- stage 2: conv2+bn2+relu, conv3+bn3, residual, add, relu ----
    out = _try_single_buffer(
        _tail, phases, resid, w2, b2, w3, b3, wd, bd,
        stride=s, t_ho=t_ho, n_hb=n_hb, identity=identity, fat_k=fat_k,
        out_dtype=out_dtype, vmem_limit=vmem_limit)
    out = out[:, :ho]                                              # drop padded rows
    return jnp.transpose(out, (0, 3, 1, 2))                        # back to NCHW


# ----------------------------- pure-JAX reference --------------------------- #

def reference(x, p, stride):
    def bn(y, stats):
        g, b, m, v = stats
        return (y - m[None, :, None, None]) / jnp.sqrt(v + EPS)[None, :, None, None] \
            * g[None, :, None, None] + b[None, :, None, None]

    def conv(y, wgt, s=1, pad=0, bias=None):
        out = lax.conv_general_dilated(y, wgt, (s, s), [(pad, pad), (pad, pad)],
                                       dimension_numbers=("NCHW", "OIHW", "NCHW"))
        if bias is not None:
            out = out + bias[None, :, None, None]
        return out

    if "convd_w" in p:
        res = bn(conv(x, p["convd_w"], s=stride, bias=p["convd_b"]), p["bnd"])
    else:
        res = x
    h = jax.nn.relu(bn(conv(x, p["conv1_w"]), p["bn1"]))
    h = jax.nn.relu(bn(conv(h, p["conv2_w"], s=stride, pad=1), p["bn2"]))
    h = bn(conv(h, p["conv3_w"]), p["bn3"])
    return jax.nn.relu(h + res)


def _check(out, ref, name):
    assert out.shape == ref.shape, (name, out.shape, ref.shape)
    max_err = float(jnp.max(jnp.abs(out - ref)))
    # Tolerance accounts for bf16 storage of activations/weights
    # (all matmuls accumulate in f32).
    if not bool(jnp.allclose(out, ref, atol=3e-2, rtol=3e-2)):
        raise SystemExit(f"{name}: mismatch vs reference, max abs err = {max_err:e}")


# ----------------------------------- main ----------------------------------- #

if __name__ == "__main__":
    key = jax.random.PRNGKey(0)
    k_param_a, k_param_b, k_xa, k_xb = jax.random.split(key, 4)

    # Config A: downsample residual (stride 2, Cin != Cout).
    N, Cin, H, W = 2, 4, 16, 16
    Cout, STRIDE = 16, 2
    params_a = init_params(k_param_a, Cin, Cout, STRIDE)
    x_a = jax.random.normal(k_xa, (N, Cin, H, W), jnp.float32)
    # Small tile params so the toy shapes still exercise multi-step grids
    # and the band-halo path (real sizes: keep the 512/1024 defaults).
    out_a = residual_block(x_a, params_a, STRIDE, tile_rows=128,
                           band_target_rows=32)
    out_a = jax.block_until_ready(out_a)
    _check(out_a, reference(x_a, params_a, STRIDE), "downsample")

    # Config B: identity residual (stride 1, Cin == Cout) -> no Wd matmul.
    params_b = init_params(k_param_b, 16, 16, 1)
    x_b = jax.random.normal(k_xb, (2, 16, 16, 16), jnp.float32)
    out_b = residual_block(x_b, params_b, 1, tile_rows=128,
                           band_target_rows=32)
    out_b = jax.block_until_ready(out_b)
    _check(out_b, reference(x_b, params_b, 1), "identity")

    # bf16 output path (what a chained block would consume downstream).
    out_b16 = residual_block(x_b, params_b, 1, tile_rows=128,
                             band_target_rows=32, out_dtype=jnp.bfloat16)
    out_b16 = jax.block_until_ready(out_b16)
    assert out_b16.dtype == jnp.bfloat16 and out_b16.shape == out_b.shape
    assert bool(jnp.allclose(out_b16.astype(jnp.float32), out_b,
                             atol=5e-2, rtol=5e-2)), "bf16 output mismatch"

    print("KERNEL_OK")
</pallas_src>

<mosaic_0001>
module attributes {stable_mosaic.version = 11 : i64} {
  func.func @_pointwise_kernel(%arg0: i32, %arg1: memref<128x4xbf16, #tpu.memory_space<vmem>>, %arg2: memref<4x4xbf16, #tpu.memory_space<vmem>>, %arg3: memref<1x4xf32, #tpu.memory_space<vmem>>, %arg4: memref<128x4xbf16, #tpu.memory_space<vmem>>) attributes {dimension_semantics = [#tpu.dimension_semantics<parallel>], iteration_bounds = array<i64: 4>, scalar_prefetch = 0 : i64, scratch_operands = 0 : i64, tpu.core_type = #tpu.core_type<tc>, window_params = [{transform_indices = @transform_0, window_bounds = array<i64: 128, 4>}, {pipeline_mode = #tpu.pipeline_mode<synchronous>, transform_indices = @transform_1, window_bounds = array<i64: 4, 4>}, {pipeline_mode = #tpu.pipeline_mode<synchronous>, transform_indices = @transform_2, window_bounds = array<i64: 1, 4>}, {transform_indices = @transform_3, window_bounds = array<i64: 128, 4>}]} {
    %c0 = arith.constant 0 : index
    %c0_0 = arith.constant 0 : index
    %0 = vector.load %arg1[%c0, %c0_0] : memref<128x4xbf16, #tpu.memory_space<vmem>>, vector<128x4xbf16>
    %c0_1 = arith.constant 0 : index
    %c0_2 = arith.constant 0 : index
    %1 = vector.load %arg2[%c0_1, %c0_2] : memref<4x4xbf16, #tpu.memory_space<vmem>>, vector<4x4xbf16>
    %cst = arith.constant dense<0.000000e+00> : vector<128x4xf32>
    %2 = tpu.matmul %0, %1, %cst {dimension_numbers = #tpu.dot_dimension_numbers<[1], [0], [0], [1], [0, 0, 1, 1], [], []>} : vector<128x4xbf16>, vector<4x4xbf16>, vector<128x4xf32> -> vector<128x4xf32>
    %c0_3 = arith.constant 0 : index
    %c0_4 = arith.constant 0 : index
    %3 = vector.load %arg3[%c0_3, %c0_4] : memref<1x4xf32, #tpu.memory_space<vmem>>, vector<1x4xf32>
    %4 = vector.broadcast %3 : vector<1x4xf32> to vector<128x4xf32>
    %5 = arith.addf %2, %4 : vector<128x4xf32>
    %cst_5 = arith.constant 0.000000e+00 : f32
    %6 = vector.broadcast %cst_5 : f32 to vector<128x4xf32>
    %7 = arith.maximumf %5, %6 : vector<128x4xf32>
    %8 = arith.truncf %7 : vector<128x4xf32> to vector<128x4xbf16>
    %c0_6 = arith.constant 0 : index
    %c0_7 = arith.constant 0 : index
    %9 = vector.load %arg4[%c0_6, %c0_7] : memref<128x4xbf16, #tpu.memory_space<vmem>>, vector<128x4xbf16>
    tpu.vector_store %arg4[%c0_6, %c0_7], %8 {strides = array<i32>} : memref<128x4xbf16, #tpu.memory_space<vmem>>, vector<128x4xbf16>,
    return
  }
  func.func @transform_0(%arg0: i32) -> (i32, i32) {
    %c0_i32 = arith.constant 0 : i32
    %c0_i32_0 = arith.constant 0 : i32
    return %arg0, %c0_i32 : i32, i32
  }
  func.func @transform_1(%arg0: i32) -> (i32, i32) {
    %c0_i32 = arith.constant 0 : i32
    %c0_i32_0 = arith.constant 0 : i32
    %c0_i32_1 = arith.constant 0 : i32
    return %c0_i32, %c0_i32_0 : i32, i32
  }
  func.func @transform_2(%arg0: i32) -> (i32, i32) {
    %c0_i32 = arith.constant 0 : i32
    %c0_i32_0 = arith.constant 0 : i32
    %c0_i32_1 = arith.constant 0 : i32
    return %c0_i32, %c0_i32_0 : i32, i32
  }
  func.func @transform_3(%arg0: i32) -> (i32, i32) {
    %c0_i32 = arith.constant 0 : i32
    %c0_i32_0 = arith.constant 0 : i32
    return %arg0, %c0_i32 : i32, i32
  }
}

module attributes {stable_mosaic.version = 11 : i64} {
  func.func @_pointwise_kernel(%arg0: i32, %arg1: memref<128x4xbf16, #tpu.memory_space<vmem>>, %arg2: memref<4x4xbf16, #tpu.memory_space<vmem>>, %arg3: memref<1x4xf32, #tpu.memory_space<vmem>>, %arg4: memref<128x4xbf16, #tpu.memory_space<vmem>>) attributes {dimension_semantics = [#tpu.dimension_semantics<parallel>], iteration_bounds = array<i64: 4>, scalar_prefetch = 0 : i64, scratch_operands = 0 : i64, tpu.core_type = #tpu.core_type<tc>, window_params = [{transform_indices = @transform_0, window_bounds = array<i64: 128, 4>}, {pipeline_mode = #tpu.pipeline_mode<synchronous>, transform_indices = @transform_1, window_bounds = array<i64: 4, 4>}, {pipeline_mode = #tpu.pipeline_mode<synchronous>, transform_indices = @transform_2, window_bounds = array<i64: 1, 4>}, {transform_indices = @transform_3, window_bounds = array<i64: 128, 4>}]} {
    %c0 = arith.constant 0 : index
    %c0_0 = arith.constant 0 : index
    %0 = vector.load %arg1[%c0, %c0_0] : memref<128x4xbf16, #tpu.memory_space<vmem>>, vector<128x4xbf16>
    %c0_1 = arith.constant 0 : index
    %c0_2 = arith.constant 0 : index
    %1 = vector.load %arg2[%c0_1, %c0_2] : memref<4x4xbf16, #tpu.memory_space<vmem>>, vector<4x4xbf16>
    %cst = arith.constant dense<0.000000e+00> : vector<128x4xf32>
    %2 = tpu.matmul %0, %1, %cst {dimension_numbers = #tpu.dot_dimension_numbers<[1], [0], [0], [1], [0, 0, 1, 1], [], []>} : vector<128x4xbf16>, vector<4x4xbf16>, vector<128x4xf32> -> vector<128x4xf32>
    %c0_3 = arith.constant 0 : index
    %c0_4 = arith.constant 0 : index
    %3 = vector.load %arg3[%c0_3, %c0_4] : memref<1x4xf32, #tpu.memory_space<vmem>>, vector<1x4xf32>
    %4 = vector.broadcast %3 : vector<1x4xf32> to vector<128x4xf32>
    %5 = arith.addf %2, %4 : vector<128x4xf32>
    %cst_5 = arith.constant 0.000000e+00 : f32
    %6 = vector.broadcast %cst_5 : f32 to vector<128x4xf32>
    %7 = arith.maximumf %5, %6 : vector<128x4xf32>
    %8 = arith.truncf %7 : vector<128x4xf32> to vector<128x4xbf16>
    %c0_6 = arith.constant 0 : index
    %c0_7 = arith.constant 0 : index
    %9 = vector.load %arg4[%c0_6, %c0_7] : memref<128x4xbf16, #tpu.memory_space<vmem>>, vector<128x4xbf16>
    tpu.vector_store %arg4[%c0_6, %c0_7], %8 {strides = array<i32>} : memref<128x4xbf16, #tpu.memory_space<vmem>>, vector<128x4xbf16>,
    return
  }
  func.func @transform_0(%arg0: i32) -> (i32, i32) {
    %c0_i32 = arith.constant 0 : i32
    %c0_i32_0 = arith.constant 0 : i32
    return %arg0, %c0_i32 : i32, i32
  }
  func.func @transform_1(%arg0: i32) -> (i32, i32) {
    %c0_i32 = arith.constant 0 : i32
    %c0_i32_0 = arith.constant 0 : i32
    %c0_i32_1 = arith.constant 0 : i32
    return %c0_i32, %c0_i32_0 : i32, i32
  }
  func.func @transform_2(%arg0: i32) -> (i32, i32) {
    %c0_i32 = arith.constant 0 : i32
    %c0_i32_0 = arith.constant 0 : i32
    %c0_i32_1 = arith.constant 0 : i32
    return %c0_i32, %c0_i32_0 : i32, i32
  }
  func.func @transform_3(%arg0: i32) -> (i32, i32) {
    %c0_i32 = arith.constant 0 : i32
    %c0_i32_0 = arith.constant 0 : i32
    return %arg0, %c0_i32 : i32, i32
  }
}

</mosaic_0001>

<bundles_post_ra>
// kernel: tpu_custom_call.1
= control target key start
LH: loop header
LB: loop body
LE: loop exit
PB: predicated region body
PF: predicated region fallthrough
CT: control target
= control target key end

     0   :  { %s653_s12 = smov 0   ;;  %s739_s0 = inlined_call_operand.vmem [shape: bf16[512,4], index: 0, kind: input, shape index: {}]   ;;  %s740_s1 = inlined_call_operand.vmem [shape: bf16[4,4], index: 1, kind: input, shape index: {}]   ;;  %s741_s2 = inlined_call_operand.vmem [shape: f32[1,4], index: 2, kind: input, shape index: {}]   ;;  %s742_s3 = inlined_call_operand.vmem [shape: bf16[512,4], index: 3, kind: output, shape index: {}]  }
   0x1 LB: > { %s518_s13 = sadd.s32 4294967295, %s631_s12   ;;  %p522_p0 = scmp.ge.s32.totalorder %s631_s12, 1  ;;  %s631_s12 = sphi %s653_s12, %s13_s12  }
   0x2   : > { %p138_p1 = scmp.lt.s32.totalorder %s631_s12, 5 }
   0x4   : > { %p139_p2 = pnand %p522_p0, %p138_p1 }
   0x5   : > { %s523_s16 = sshll.u32 (!%p139_p2), %s518_s13, 4 }
   0x6   : > { %142 = sbr.rel (%p139_p2) target bundleno = 231 (0xe7), region = 32  ;;  %p163_p3 = scmp.lt.s32.totalorder (!%p139_p2), %s523_s16, 63 }
   0xb   : > { %v191_v0 = vld [vmem:[%s740_s1] sm:$0x3]  ;;  %vm264_vm0 = vcmask 1041408   ;;  %s744_s16 = smov (!%p163_p3, %s523_s16), 63  ;;  %vm239_vm1 = vcmask 31744   ;;  %vm445_vm2 = vcmask 27648  }
   0xc   : > { %607 = vmatprep.subr.msk.bf16.mxu0 %vm264_vm0, %v191_v0  ;;  %608 = vmatprep.subr.msk.bf16.mxu1 %vm264_vm0, %v191_v0  ;;  %v266_v1 = vsel %vm264_vm0, %v191_v0, 0  ;;  %s524_s17 = sshll.u32 %s744_s16, 2  ;;  %v681_v10 = vld [vmem:[%s741_s2] ss:$0 sm:$0xff] }
   0xd   : > { %588 = vmatpush3.bf16.msra.mxu0 %v266_v1  ;;  %606 = vmatpush3.bf16.msra.mxu1 %v266_v1  ;;  %s166_s20 = scalar_lea.vmem %s739_s0, %s524_s17  ;;  %s689_s25 = scalar_lea.vmem %s742_s3, %s524_s17 }
   0xe   : > { %v617_v2 = vld [vmem:[%s166_s20] sm:$0xff]   ;;  %v619_v4 = vld [vmem:[%s166_s20 + $0x8] sm:$0xff]   ;;  %v621_v6 = vld [vmem:[%s166_s20 + $0x10] sm:$0xff]  }
   0xf   : > { %v618_v3 = vld [vmem:[%s166_s20 + $0x20] sm:$0xff]   ;;  %589 = vmatprep.mubr.msk.bf16.mxu0 %vm239_vm1, %v617_v2  ;;  %v620_v5 = vld [vmem:[%s166_s20 + $0x28] sm:$0xff]   ;;  %v622_v7 = vld [vmem:[%s166_s20 + $0x30] sm:$0xff]  }
  0x10   : > { %597 = vmatprep.mubr.msk.bf16.mxu1 %vm239_vm1, %v618_v3  ;;  %590 = vmatmul.mubr.msk.bf16.vlgmr.msra.gmra.mxu0 %vm239_vm1, %v619_v4  ;;  %v623_v8 = vld [vmem:[%s166_s20 + $0x18] sm:$0xff]  }
  0x11   : > { %598 = vmatmul.mubr.msk.bf16.vlgmr.msra.gmra.mxu1 %vm239_vm1, %v620_v5  ;;  %593 = vmatprep.mubr.msk.bf16.mxu0 %vm239_vm1, %v621_v6  ;;  %v624_v9 = vld [vmem:[%s166_s20 + $0x38] sm:$0xff]  }
  0x12   : > { %601 = vmatprep.mubr.msk.bf16.mxu1 %vm239_vm1, %v622_v7 }
  0x18   : > { %594 = vmatmul.mubr.msk.bf16.gmra.mxu0 %vm239_vm1, %v623_v8 }
  0x19   : > { %602 = vmatmul.mubr.msk.bf16.gmra.mxu1 %vm239_vm1, %v624_v9 }
  0xd0   : > { %v591_v11 = vpop.f32.mrf.mxu0 }
  0xd1   : > { %v311_v12 = vadd.f32 %v591_v11, %v681_v10  ;;  %v599_v13 = vpop.f32.mrf.mxu1 }
  0xd2   : > { %v343_v14 = vadd.f32 %v599_v13, %v681_v10  ;;  %v302_v15 = vpop.f32.mrf.mxu0 }
  0xd3   : > { %v367_v16 = vmax.f32 %v311_v12, 0.0  ;;  %v303_v17 = vadd.f32 %v681_v10, %v302_v15  ;;  %v334_v18 = vpop.f32.mrf.mxu1 }
  0xd4   : > { %v375_v19 = vmax.f32 %v343_v14, 0.0  ;;  %v335_v20 = vadd.f32 %v681_v10, %v334_v18  ;;  %v592_v21 = vpop.f32.mrf.mxu0 }
  0xd5   : > { %v564_v22 = vpack.c.bf16 %v367_v16, %v367_v16  ;;  %v365_v23 = vmax.f32 %v303_v17, 0.0  ;;  %v314_v24 = vadd.f32 %v592_v21, %v681_v10  ;;  %v600_v25 = vpop.f32.mrf.mxu1 }
  0xd6   : > { %v572_v26 = vpack.c.bf16 %v375_v19, %v375_v19  ;;  %v373_v27 = vmax.f32 %v335_v20, 0.0  ;;  %v346_v28 = vadd.f32 %v600_v25, %v681_v10  ;;  %v305_v29 = vpop.f32.mrf.mxu0 }
  0xd7   : > { %448 = vst.msk [vmem:[%s689_s25 + $0x8] sm:$0xf] %vm445_vm2, %v564_v22  ;;  %v562_v30 = vpack.c.bf16 %v365_v23, %v365_v23  ;;  %v368_v31 = vmax.f32 %v314_v24, 0.0  ;;  %v306_v32 = vadd.f32 %v681_v10, %v305_v29  ;;  %v337_v33 = vpop.f32.mrf.mxu1 }
  0xd8   : > { %456 = vst.msk [vmem:[%s689_s25 + $0x28] sm:$0xf] %vm445_vm2, %v572_v26  ;;  %v570_v34 = vpack.c.bf16 %v373_v27, %v373_v27  ;;  %v376_v35 = vmax.f32 %v346_v28, 0.0  ;;  %v338_v36 = vadd.f32 %v681_v10, %v337_v33  ;;  %v595_v37 = vpop.f32.mrf.mxu0 }
  0xd9   : > { %446 = vst.msk [vmem:[%s689_s25] sm:$0xf] %vm445_vm2, %v562_v30  ;;  %v565_v38 = vpack.c.bf16 %v368_v31, %v368_v31  ;;  %v366_v39 = vmax.f32 %v306_v32, 0.0  ;;  %v327_v40 = vadd.f32 %v595_v37, %v681_v10  ;;  %v603_v41 = vpop.f32.mrf.mxu1 }
  0xda   : > { %454 = vst.msk [vmem:[%s689_s25 + $0x20] sm:$0xf] %vm445_vm2, %v570_v34  ;;  %v573_v42 = vpack.c.bf16 %v376_v35, %v376_v35  ;;  %v374_v43 = vmax.f32 %v338_v36, 0.0  ;;  %v359_v44 = vadd.f32 %v603_v41, %v681_v10  ;;  %v318_v45 = vpop.f32.mrf.mxu0 }
  0xdb   : > { %449 = vst.msk [vmem:[%s689_s25 + $0xc] sm:$0xf] %vm445_vm2, %v565_v38  ;;  %v563_v46 = vpack.c.bf16 %v366_v39, %v366_v39  ;;  %v371_v47 = vmax.f32 %v327_v40, 0.0  ;;  %v319_v48 = vadd.f32 %v681_v10, %v318_v45  ;;  %v350_v49 = vpop.f32.mrf.mxu1 }
  0xdc   : > { %457 = vst.msk [vmem:[%s689_s25 + $0x2c] sm:$0xf] %vm445_vm2, %v573_v42  ;;  %v571_v50 = vpack.c.bf16 %v374_v43, %v374_v43  ;;  %v379_v51 = vmax.f32 %v359_v44, 0.0  ;;  %v351_v52 = vadd.f32 %v681_v10, %v350_v49  ;;  %v596_v53 = vpop.f32.mrf.mxu0 }
  0xdd   : > { %447 = vst.msk [vmem:[%s689_s25 + $0x4] sm:$0xf] %vm445_vm2, %v563_v46  ;;  %v568_v54 = vpack.c.bf16 %v371_v47, %v371_v47  ;;  %v369_v55 = vmax.f32 %v319_v48, 0.0  ;;  %v330_v56 = vadd.f32 %v596_v53, %v681_v10  ;;  %v604_v57 = vpop.f32.mrf.mxu1 }
  0xde   : > { %455 = vst.msk [vmem:[%s689_s25 + $0x24] sm:$0xf] %vm445_vm2, %v571_v50  ;;  %v576_v58 = vpack.c.bf16 %v379_v51, %v379_v51  ;;  %v377_v59 = vmax.f32 %v351_v52, 0.0  ;;  %v362_v60 = vadd.f32 %v604_v57, %v681_v10  ;;  %v321_v61 = vpop.f32.mrf.mxu0 }
  0xdf   : > { %452 = vst.msk [vmem:[%s689_s25 + $0x18] sm:$0xf] %vm445_vm2, %v568_v54  ;;  %v566_v62 = vpack.c.bf16 %v369_v55, %v369_v55  ;;  %v372_v63 = vmax.f32 %v330_v56, 0.0  ;;  %v322_v0 = vadd.f32 %v681_v10, %v321_v61  ;;  %v353_v1 = vpop.f32.mrf.mxu1 }
  0xe0   : > { %460 = vst.msk [vmem:[%s689_s25 + $0x38] sm:$0xf] %vm445_vm2, %v576_v58  ;;  %v574_v2 = vpack.c.bf16 %v377_v59, %v377_v59  ;;  %v380_v3 = vmax.f32 %v362_v60, 0.0  ;;  %v354_v4 = vadd.f32 %v681_v10, %v353_v1 }
  0xe1   : > { %450 = vst.msk [vmem:[%s689_s25 + $0x10] sm:$0xf] %vm445_vm2, %v566_v62  ;;  %v569_v5 = vpack.c.bf16 %v372_v63, %v372_v63  ;;  %v370_v6 = vmax.f32 %v322_v0, 0.0 }
  0xe2   : > { %458 = vst.msk [vmem:[%s689_s25 + $0x30] sm:$0xf] %vm445_vm2, %v574_v2  ;;  %v577_v7 = vpack.c.bf16 %v380_v3, %v380_v3  ;;  %v378_v8 = vmax.f32 %v354_v4, 0.0 }
  0xe3   : > { %453 = vst.msk [vmem:[%s689_s25 + $0x1c] sm:$0xf] %vm445_vm2, %v569_v5  ;;  %v567_v9 = vpack.c.bf16 %v370_v6, %v370_v6 }
  0xe4   : > { %461 = vst.msk [vmem:[%s689_s25 + $0x3c] sm:$0xf] %vm445_vm2, %v577_v7  ;;  %v575_v11 = vpack.c.bf16 %v378_v8, %v378_v8 }
  0xe5   : > { %451 = vst.msk [vmem:[%s689_s25 + $0x14] sm:$0xf] %vm445_vm2, %v567_v9 }
  0xe6   : > { %459 = vst.msk [vmem:[%s689_s25 + $0x34] sm:$0xf] %vm445_vm2, %v575_v11 }
  0xe7 PF: > { %s13_s12 = sadd.s32 1, %s631_s12  }
  0xe8   : > { %p10_p4 = scmp.ge.s32.totalorder %s13_s12, 6  }
  0xea   :  { %12 = sbr.rel (!%p10_p4) target bundleno = 1 (0x1), region = 62 }

// kernel: tpu_custom_call.1
= control target key start
LH: loop header
LB: loop body
LE: loop exit
PB: predicated region body
PF: predicated region fallthrough
CT: control target
= control target key end

     0   :  { %s653_s12 = smov 0   ;;  %s739_s0 = inlined_call_operand.vmem [shape: bf16[512,4], index: 0, kind: input, shape index: {}]   ;;  %s740_s1 = inlined_call_operand.vmem [shape: bf16[4,4], index: 1, kind: input, shape index: {}]   ;;  %s741_s2 = inlined_call_operand.vmem [shape: f32[1,4], index: 2, kind: input, shape index: {}]   ;;  %s742_s3 = inlined_call_operand.vmem [shape: bf16[512,4], index: 3, kind: output, shape index: {}]  }
   0x1 LB: > { %s518_s13 = sadd.s32 4294967295, %s631_s12   ;;  %p522_p0 = scmp.ge.s32.totalorder %s631_s12, 1  ;;  %s631_s12 = sphi %s653_s12, %s13_s12  }
   0x2   : > { %p138_p1 = scmp.lt.s32.totalorder %s631_s12, 5 }
   0x4   : > { %p139_p2 = pnand %p522_p0, %p138_p1 }
   0x5   : > { %s523_s16 = sshll.u32 (!%p139_p2), %s518_s13, 4 }
   0x6   : > { %142 = sbr.rel (%p139_p2) target bundleno = 231 (0xe7), region = 32  ;;  %p163_p3 = scmp.lt.s32.totalorder (!%p139_p2), %s523_s16, 63 }
   0xb   : > { %v191_v0 = vld [vmem:[%s740_s1] sm:$0x3]  ;;  %vm264_vm0 = vcmask 1041408   ;;  %s744_s16 = smov (!%p163_p3, %s523_s16), 63  ;;  %vm239_vm1 = vcmask 31744   ;;  %vm445_vm2 = vcmask 27648  }
   0xc   : > { %607 = vmatprep.subr.msk.bf16.mxu0 %vm264_vm0, %v191_v0  ;;  %608 = vmatprep.subr.msk.bf16.mxu1 %vm264_vm0, %v191_v0  ;;  %v266_v1 = vsel %vm264_vm0, %v191_v0, 0  ;;  %s524_s17 = sshll.u32 %s744_s16, 2  ;;  %v681_v10 = vld [vmem:[%s741_s2] ss:$0 sm:$0xff] }
   0xd   : > { %588 = vmatpush3.bf16.msra.mxu0 %v266_v1  ;;  %606 = vmatpush3.bf16.msra.mxu1 %v266_v1  ;;  %s166_s20 = scalar_lea.vmem %s739_s0, %s524_s17  ;;  %s689_s25 = scalar_lea.vmem %s742_s3, %s524_s17 }
   0xe   : > { %v617_v2 = vld [vmem:[%s166_s20] sm:$0xff]   ;;  %v619_v4 = vld [vmem:[%s166_s20 + $0x8] sm:$0xff]   ;;  %v621_v6 = vld [vmem:[%s166_s20 + $0x10] sm:$0xff]  }
   0xf   : > { %v618_v3 = vld [vmem:[%s166_s20 + $0x20] sm:$0xff]   ;;  %589 = vmatprep.mubr.msk.bf16.mxu0 %vm239_vm1, %v617_v2  ;;  %v620_v5 = vld [vmem:[%s166_s20 + $0x28] sm:$0xff]   ;;  %v622_v7 = vld [vmem:[%s166_s20 + $0x30] sm:$0xff]  }
  0x10   : > { %597 = vmatprep.mubr.msk.bf16.mxu1 %vm239_vm1, %v618_v3  ;;  %590 = vmatmul.mubr.msk.bf16.vlgmr.msra.gmra.mxu0 %vm239_vm1, %v619_v4  ;;  %v623_v8 = vld [vmem:[%s166_s20 + $0x18] sm:$0xff]  }
  0x11   : > { %598 = vmatmul.mubr.msk.bf16.vlgmr.msra.gmra.mxu1 %vm239_vm1, %v620_v5  ;;  %593 = vmatprep.mubr.msk.bf16.mxu0 %vm239_vm1, %v621_v6  ;;  %v624_v9 = vld [vmem:[%s166_s20 + $0x38] sm:$0xff]  }
  0x12   : > { %601 = vmatprep.mubr.msk.bf16.mxu1 %vm239_vm1, %v622_v7 }
  0x18   : > { %594 = vmatmul.mubr.msk.bf16.gmra.mxu0 %vm239_vm1, %v623_v8 }
  0x19   : > { %602 = vmatmul.mubr.msk.bf16.gmra.mxu1 %vm239_vm1, %v624_v9 }
  0xd0   : > { %v591_v11 = vpop.f32.mrf.mxu0 }
  0xd1   : > { %v311_v12 = vadd.f32 %v591_v11, %v681_v10  ;;  %v599_v13 = vpop.f32.mrf.mxu1 }
  0xd2   : > { %v343_v14 = vadd.f32 %v599_v13, %v681_v10  ;;  %v302_v15 = vpop.f32.mrf.mxu0 }
  0xd3   : > { %v367_v16 = vmax.f32 %v311_v12, 0.0  ;;  %v303_v17 = vadd.f32 %v681_v10, %v302_v15  ;;  %v334_v18 = vpop.f32.mrf.mxu1 }
  0xd4   : > { %v375_v19 = vmax.f32 %v343_v14, 0.0  ;;  %v335_v20 = vadd.f32 %v681_v10, %v334_v18  ;;  %v592_v21 = vpop.f32.mrf.mxu0 }
  0xd5   : > { %v564_v22 = vpack.c.bf16 %v367_v16, %v367_v16  ;;  %v365_v23 = vmax.f32 %v303_v17, 0.0  ;;  %v314_v24 = vadd.f32 %v592_v21, %v681_v10  ;;  %v600_v25 = vpop.f32.mrf.mxu1 }
  0xd6   : > { %v572_v26 = vpack.c.bf16 %v375_v19, %v375_v19  ;;  %v373_v27 = vmax.f32 %v335_v20, 0.0  ;;  %v346_v28 = vadd.f32 %v600_v25, %v681_v10  ;;  %v305_v29 = vpop.f32.mrf.mxu0 }
  0xd7   : > { %448 = vst.msk [vmem:[%s689_s25 + $0x8] sm:$0xf] %vm445_vm2, %v564_v22  ;;  %v562_v30 = vpack.c.bf16 %v365_v23, %v365_v23  ;;  %v368_v31 = vmax.f32 %v314_v24, 0.0  ;;  %v306_v32 = vadd.f32 %v681_v10, %v305_v29  ;;  %v337_v33 = vpop.f32.mrf.mxu1 }
  0xd8   : > { %456 = vst.msk [vmem:[%s689_s25 + $0x28] sm:$0xf] %vm445_vm2, %v572_v26  ;;  %v570_v34 = vpack.c.bf16 %v373_v27, %v373_v27  ;;  %v376_v35 = vmax.f32 %v346_v28, 0.0  ;;  %v338_v36 = vadd.f32 %v681_v10, %v337_v33  ;;  %v595_v37 = vpop.f32.mrf.mxu0 }
  0xd9   : > { %446 = vst.msk [vmem:[%s689_s25] sm:$0xf] %vm445_vm2, %v562_v30  ;;  %v565_v38 = vpack.c.bf16 %v368_v31, %v368_v31  ;;  %v366_v39 = vmax.f32 %v306_v32, 0.0  ;;  %v327_v40 = vadd.f32 %v595_v37, %v681_v10  ;;  %v603_v41 = vpop.f32.mrf.mxu1 }
  0xda   : > { %454 = vst.msk [vmem:[%s689_s25 + $0x20] sm:$0xf] %vm445_vm2, %v570_v34  ;;  %v573_v42 = vpack.c.bf16 %v376_v35, %v376_v35  ;;  %v374_v43 = vmax.f32 %v338_v36, 0.0  ;;  %v359_v44 = vadd.f32 %v603_v41, %v681_v10  ;;  %v318_v45 = vpop.f32.mrf.mxu0 }
  0xdb   : > { %449 = vst.msk [vmem:[%s689_s25 + $0xc] sm:$0xf] %vm445_vm2, %v565_v38  ;;  %v563_v46 = vpack.c.bf16 %v366_v39, %v366_v39  ;;  %v371_v47 = vmax.f32 %v327_v40, 0.0  ;;  %v319_v48 = vadd.f32 %v681_v10, %v318_v45  ;;  %v350_v49 = vpop.f32.mrf.mxu1 }
  0xdc   : > { %457 = vst.msk [vmem:[%s689_s25 + $0x2c] sm:$0xf] %vm445_vm2, %v573_v42  ;;  %v571_v50 = vpack.c.bf16 %v374_v43, %v374_v43  ;;  %v379_v51 = vmax.f32 %v359_v44, 0.0  ;;  %v351_v52 = vadd.f32 %v681_v10, %v350_v49  ;;  %v596_v53 = vpop.f32.mrf.mxu0 }
  0xdd   : > { %447 = vst.msk [vmem:[%s689_s25 + $0x4] sm:$0xf] %vm445_vm2, %v563_v46  ;;  %v568_v54 = vpack.c.bf16 %v371_v47, %v371_v47  ;;  %v369_v55 = vmax.f32 %v319_v48, 0.0  ;;  %v330_v56 = vadd.f32 %v596_v53, %v681_v10  ;;  %v604_v57 = vpop.f32.mrf.mxu1 }
  0xde   : > { %455 = vst.msk [vmem:[%s689_s25 + $0x24] sm:$0xf] %vm445_vm2, %v571_v50  ;;  %v576_v58 = vpack.c.bf16 %v379_v51, %v379_v51  ;;  %v377_v59 = vmax.f32 %v351_v52, 0.0  ;;  %v362_v60 = vadd.f32 %v604_v57, %v681_v10  ;;  %v321_v61 = vpop.f32.mrf.mxu0 }
  0xdf   : > { %452 = vst.msk [vmem:[%s689_s25 + $0x18] sm:$0xf] %vm445_vm2, %v568_v54  ;;  %v566_v62 = vpack.c.bf16 %v369_v55, %v369_v55  ;;  %v372_v63 = vmax.f32 %v330_v56, 0.0  ;;  %v322_v0 = vadd.f32 %v681_v10, %v321_v61  ;;  %v353_v1 = vpop.f32.mrf.mxu1 }
  0xe0   : > { %460 = vst.msk [vmem:[%s689_s25 + $0x38] sm:$0xf] %vm445_vm2, %v576_v58  ;;  %v574_v2 = vpack.c.bf16 %v377_v59, %v377_v59  ;;  %v380_v3 = vmax.f32 %v362_v60, 0.0  ;;  %v354_v4 = vadd.f32 %v681_v10, %v353_v1 }
  0xe1   : > { %450 = vst.msk [vmem:[%s689_s25 + $0x10] sm:$0xf] %vm445_vm2, %v566_v62  ;;  %v569_v5 = vpack.c.bf16 %v372_v63, %v372_v63  ;;  %v370_v6 = vmax.f32 %v322_v0, 0.0 }
  0xe2   : > { %458 = vst.msk [vmem:[%s689_s25 + $0x30] sm:$0xf] %vm445_vm2, %v574_v2  ;;  %v577_v7 = vpack.c.bf16 %v380_v3, %v380_v3  ;;  %v378_v8 = vmax.f32 %v354_v4, 0.0 }
  0xe3   : > { %453 = vst.msk [vmem:[%s689_s25 + $0x1c] sm:$0xf] %vm445_vm2, %v569_v5  ;;  %v567_v9 = vpack.c.bf16 %v370_v6, %v370_v6 }
  0xe4   : > { %461 = vst.msk [vmem:[%s689_s25 + $0x3c] sm:$0xf] %vm445_vm2, %v577_v7  ;;  %v575_v11 = vpack.c.bf16 %v378_v8, %v378_v8 }
  0xe5   : > { %451 = vst.msk [vmem:[%s689_s25 + $0x14] sm:$0xf] %vm445_vm2, %v567_v9 }
  0xe6   : > { %459 = vst.msk [vmem:[%s689_s25 + $0x34] sm:$0xf] %vm445_vm2, %v575_v11 }
  0xe7 PF: > { %s13_s12 = sadd.s32 1, %s631_s12  }
  0xe8   : > { %p10_p4 = scmp.ge.s32.totalorder %s13_s12, 6  }
  0xea   :  { %12 = sbr.rel (!%p10_p4) target bundleno = 1 (0x1), region = 62 }

</bundles_post_ra>
